<compile_context>
chip_gen: v7x
topology: tpu7x:2x2x1
jax: 0.10.0
libtpu: 0.0.40
codegen_flags: <defaults>
</compile_context>

<pallas_src>
import functools

import jax
import jax.numpy as jnp
from jax.experimental import pallas as pl
from jax.experimental.pallas import tpu as pltpu


def _round_up(x, m):
    return (x + m - 1) // m * m


def _vmem_bytes(*dims):
    """f32 VMEM footprint of one buffer with (8,128) tiling on the minor dims."""
    ds = list(dims)
    ds[-1] = _round_up(ds[-1], 128)
    if len(ds) >= 2:
        ds[-2] = _round_up(ds[-2], 8)
    n = 1
    for d in ds:
        n *= d
    return 4 * n


def _build_row_toeplitz(w, Wp, Wo):
    """w: (Cout, Cin, KH, KW) -> T: (KH, Wp*Cin, Wo*Cout) with
    T[kh, (wo+kw)*Cin + ci, wo*Cout + co] = w[co, ci, kh, kw]."""
    Cout, Cin, KH, KW = w.shape
    wk = jnp.transpose(w, (2, 3, 1, 0))                 # (KH, KW, Cin, Cout)
    eye_wo = jnp.eye(Wo, dtype=w.dtype)
    T = jnp.zeros((KH, Wp * Cin, Wo * Cout), w.dtype)
    for kh in range(KH):
        for kw in range(KW):
            blk = jnp.einsum("uv,ab->uavb", eye_wo, wk[kh, kw])
            blk = blk.reshape(Wo * Cin, Wo * Cout)
            T = T.at[kh, kw * Cin:(kw + Wo) * Cin, :].add(blk)
    return T


def conv_bn_lrelu(x_nchw, conv_w, conv_b, bn_gamma, bn_beta, *,
                  stride=1, padding=0, eps=1e-5, negative_slope=0.2):
    """Forward of ConvBNLReLU (BatchNorm2d with training-mode batch stats)."""
    if stride != 1:
        # TODO(synk): strided conv (stride != 1) is not implemented in this kernel.
        raise NotImplementedError("stride != 1 is not supported")

    f32 = jnp.float32
    N, Cin, H, W = x_nchw.shape
    Cout, Cin_w, KH, KW = conv_w.shape
    assert Cin_w == Cin

    # ---- wrapper glue: NCHW -> NHWC, zero-pad, flatten rows across images ----
    x = jnp.transpose(x_nchw, (0, 2, 3, 1)).astype(f32)
    if padding > 0:
        x = jnp.pad(x, ((0, 0), (padding, padding), (padding, padding), (0, 0)))
    Hp, Wp = H + 2 * padding, W + 2 * padding
    Ho, Wo = Hp - KH + 1, Wp - KW + 1
    assert Ho >= 1 and Wo >= 1

    LANES = Wo * Cout                 # output lane width (128 for these shapes)
    # TODO(synk): for other shapes pad Cout so LANES is a multiple of 128 and
    # stores stay unmasked; here Wo*Cout == 128 already.
    K = Wp * Cin
    Kpad = _round_up(K, 128)          # pad contraction dim to full 128-lane vregs

    R = N * Hp                        # conv window-start rows that get computed
    # Row tile: as large as the ~40-vreg budget (acc + loaded window) allows.
    TH_cap = max(8, ((160 * 1024) // (4 * (LANES + Kpad))) // 8 * 8)
    TH = min(TH_cap, _round_up(R, 8))
    R_pad = _round_up(R, TH)
    nblk = R_pad // TH
    WIN = TH + (_round_up(KH - 1, 8) if KH > 1 else 0)   # aligned window length
    R_x = R_pad + (WIN - TH)

    x_flat = x.reshape(R, K)
    x_flat = jnp.pad(x_flat, ((0, R_x - R), (0, Kpad - K)))       # (R_x, Kpad)

    # Row-Toeplitz conv weights (resident in VMEM, built once, tiny here).
    # TODO(synk): for large Wo*Cout this (KH, Kpad, LANES) slab should be blocked
    # over Wo (it can exceed v7x's 64 MiB VMEM long before v5e/v6e's 128 MiB).
    T = _build_row_toeplitz(conv_w.astype(f32), Wp, Wo)           # (KH, K, LANES)
    T = jnp.pad(T, ((0, 0), (0, Kpad - K), (0, 0)))               # (KH, Kpad, LANES)

    bias_l = jnp.tile(conv_b.astype(f32), (Wo,)).reshape(1, LANES)

    # Valid-row mask: row r is a real output row iff r < N*Hp and (r mod Hp) < Ho.
    ridx = jnp.arange(R_pad)
    mask = ((ridx < R) & ((ridx % Hp) < Ho)).astype(f32).reshape(R_pad, 1)

    # ---------------- kernel A: conv + batch-stats accumulation ----------------
    def conv_stats_kernel(x_ref, t_ref, b_ref, m_ref, y_ref, s_ref, q_ref):
        blk = pl.program_id(0)
        row0 = pl.multiple_of(blk * TH, 8)
        # One sublane-aligned window load; the kh shifts are static slices.
        win = x_ref[pl.ds(row0, WIN), :]                          # (WIN, Kpad)

        acc = jnp.zeros((TH, LANES), f32)
        for kh in range(KH):                                      # KH MXU matmuls
            acc = acc + jnp.dot(win[kh:kh + TH, :], t_ref[kh],
                                preferred_element_type=f32)
        acc = acc + b_ref[...]                                    # conv bias
        y_ref[...] = acc                                          # unnormalized out

        @pl.when(blk == 0)
        def _init():
            s_ref[...] = jnp.zeros_like(s_ref)
            q_ref[...] = jnp.zeros_like(q_ref)

        vm = acc * m_ref[...]                                     # mask junk rows (VPU)
        s_ref[...] += jnp.sum(vm, axis=0, keepdims=True)          # (1, LANES)
        q_ref[...] += jnp.sum(vm * acc, axis=0, keepdims=True)

    resident_a = (_vmem_bytes(R_x, Kpad) + _vmem_bytes(KH, Kpad, LANES)
                  + 3 * _vmem_bytes(1, LANES) + _vmem_bytes(TH, 1)
                  + _vmem_bytes(TH, LANES))
    vmem_a = int(2 * resident_a + (4 << 20))      # 2x double-buffer + headroom

    # TODO(synk): on v7x the stats pass could use per-core partial accumulators
    # (VMEM_SHARED + core_barrier) to use both TensorCores; kept single-core here.
    y, sum_lane, sq_lane = pl.pallas_call(
        conv_stats_kernel,
        out_shape=(jax.ShapeDtypeStruct((R_pad, LANES), f32),
                   jax.ShapeDtypeStruct((1, LANES), f32),
                   jax.ShapeDtypeStruct((1, LANES), f32)),
        grid=(nblk,),
        in_specs=[
            pl.BlockSpec((R_x, Kpad), lambda i: (0, 0)),          # resident rows
            pl.BlockSpec((KH, Kpad, LANES), lambda i: (0, 0, 0)), # resident weights
            pl.BlockSpec((1, LANES), lambda i: (0, 0)),           # bias
            pl.BlockSpec((TH, 1), lambda i: (i, 0)),              # row mask tile
        ],
        out_specs=(
            pl.BlockSpec((TH, LANES), lambda i: (i, 0)),          # conv result
            pl.BlockSpec((1, LANES), lambda i: (0, 0)),           # resident sum
            pl.BlockSpec((1, LANES), lambda i: (0, 0)),           # resident sum-sq
        ),
        compiler_params=pltpu.CompilerParams(
            dimension_semantics=("arbitrary",),                   # carried stats
            vmem_limit_bytes=vmem_a),
    )(x_flat, T, bias_l, mask)

    # ---- tiny per-channel epilogue in plain JAX (Cout elements, runs once) ----
    count = float(N * Ho * Wo)
    sum_c = sum_lane.reshape(Wo, Cout).sum(axis=0)
    sq_c = sq_lane.reshape(Wo, Cout).sum(axis=0)
    mean = sum_c / count
    var = jnp.maximum(sq_c / count - mean * mean, 0.0)            # biased variance
    inv_std = jax.lax.rsqrt(var + eps)
    scale = bn_gamma.astype(f32) * inv_std
    shift = bn_beta.astype(f32) - mean * scale
    scale_l = jnp.tile(scale, (Wo,)).reshape(1, LANES)
    shift_l = jnp.tile(shift, (Wo,)).reshape(1, LANES)

    # ------------- kernel B: normalize + LeakyReLU (pure VPU, mem-bound) -------------
    TB = min(R_pad, 1024) // 8 * 8
    while TB > 8 and R_pad % TB != 0:
        TB -= 8
    TB = max(TB, 8)

    def norm_lrelu_kernel(y_ref, sc_ref, sh_ref, o_ref):
        z = y_ref[...] * sc_ref[...] + sh_ref[...]
        o_ref[...] = jnp.where(z > 0, z, negative_slope * z)

    vmem_b = int(2 * (2 * _vmem_bytes(TB, LANES) + 2 * _vmem_bytes(1, LANES))
                 + (4 << 20))

    out_flat = pl.pallas_call(
        norm_lrelu_kernel,
        out_shape=jax.ShapeDtypeStruct((R_pad, LANES), f32),
        grid=(R_pad // TB,),
        in_specs=[
            pl.BlockSpec((TB, LANES), lambda i: (i, 0)),
            pl.BlockSpec((1, LANES), lambda i: (0, 0)),
            pl.BlockSpec((1, LANES), lambda i: (0, 0)),
        ],
        out_specs=pl.BlockSpec((TB, LANES), lambda i: (i, 0)),
        input_output_aliases={0: 0},                              # normalize in place
        compiler_params=pltpu.CompilerParams(
            dimension_semantics=("parallel",),                    # megacore on v7x
            vmem_limit_bytes=vmem_b),
    )(y, scale_l, shift_l)

    # Drop junk / pad rows, reshape back to NCHW.
    out = out_flat[:R].reshape(N, Hp, Wo, Cout)[:, :Ho]
    return jnp.transpose(out, (0, 3, 1, 2))


def _reference(x, w, b, gamma, beta, *, padding, eps=1e-5, neg=0.2):
    """Pure-JAX mirror of the PyTorch forward (training-mode BN, with bias)."""
    y = jax.lax.conv_general_dilated(
        x, w, window_strides=(1, 1),
        padding=[(padding, padding), (padding, padding)],
        dimension_numbers=("NCHW", "OIHW", "NCHW"))
    y = y + b.reshape(1, -1, 1, 1)
    mean = jnp.mean(y, axis=(0, 2, 3), keepdims=True)
    var = jnp.mean((y - mean) ** 2, axis=(0, 2, 3), keepdims=True)
    y = (y - mean) / jnp.sqrt(var + eps)
    y = y * gamma.reshape(1, -1, 1, 1) + beta.reshape(1, -1, 1, 1)
    return jnp.where(y > 0, y, neg * y)


if __name__ == "__main__":
    N, Cin, H, W = 2, 4, 16, 16
    Cout, Ksz, pad = 8, 3, 1

    key = jax.random.PRNGKey(0)
    kx, kw, kb, kg, kbe = jax.random.split(key, 5)
    x = jax.random.normal(kx, (N, Cin, H, W), dtype=jnp.float32)
    conv_w = jax.random.normal(kw, (Cout, Cin, Ksz, Ksz), dtype=jnp.float32) * 0.1
    conv_b = jax.random.normal(kb, (Cout,), dtype=jnp.float32) * 0.1
    bn_w = 1.0 + 0.1 * jax.random.normal(kg, (Cout,), dtype=jnp.float32)
    bn_b = 0.1 * jax.random.normal(kbe, (Cout,), dtype=jnp.float32)

    fwd = jax.jit(functools.partial(conv_bn_lrelu, stride=1, padding=pad))
    out = jax.block_until_ready(fwd(x, conv_w, conv_b, bn_w, bn_b))

    ref = _reference(x, conv_w, conv_b, bn_w, bn_b, padding=pad)
    assert out.shape == ref.shape == (N, Cout, H, W), out.shape
    max_err = float(jnp.max(jnp.abs(out - ref)))
    assert jnp.allclose(out, ref, atol=2e-4, rtol=2e-4), max_err

    print("KERNEL_OK")
</pallas_src>

<mosaic_0001>
module attributes {stable_mosaic.version = 11 : i64} {
  func.func @norm_lrelu_kernel(%arg0: i32, %arg1: memref<40x128xf32, #tpu.memory_space<vmem>>, %arg2: memref<1x128xf32, #tpu.memory_space<vmem>>, %arg3: memref<1x128xf32, #tpu.memory_space<vmem>>, %arg4: memref<40x128xf32, #tpu.memory_space<vmem>>) attributes {dimension_semantics = [#tpu.dimension_semantics<parallel>], iteration_bounds = array<i64: 1>, scalar_prefetch = 0 : i64, scratch_operands = 0 : i64, tpu.core_type = #tpu.core_type<tc>, window_params = [{transform_indices = @transform_0, window_bounds = array<i64: 40, 128>}, {pipeline_mode = #tpu.pipeline_mode<synchronous>, transform_indices = @transform_1, window_bounds = array<i64: 1, 128>}, {pipeline_mode = #tpu.pipeline_mode<synchronous>, transform_indices = @transform_2, window_bounds = array<i64: 1, 128>}, {transform_indices = @transform_3, window_bounds = array<i64: 40, 128>}]} {
    %c0 = arith.constant 0 : index
    %c0_0 = arith.constant 0 : index
    %0 = vector.load %arg1[%c0, %c0_0] : memref<40x128xf32, #tpu.memory_space<vmem>>, vector<40x128xf32>
    %c0_1 = arith.constant 0 : index
    %c0_2 = arith.constant 0 : index
    %1 = vector.load %arg2[%c0_1, %c0_2] : memref<1x128xf32, #tpu.memory_space<vmem>>, vector<1x128xf32>
    %2 = vector.broadcast %1 : vector<1x128xf32> to vector<40x128xf32>
    %3 = arith.mulf %0, %2 : vector<40x128xf32>
    %c0_3 = arith.constant 0 : index
    %c0_4 = arith.constant 0 : index
    %4 = vector.load %arg3[%c0_3, %c0_4] : memref<1x128xf32, #tpu.memory_space<vmem>>, vector<1x128xf32>
    %5 = vector.broadcast %4 : vector<1x128xf32> to vector<40x128xf32>
    %6 = arith.addf %3, %5 : vector<40x128xf32>
    %cst = arith.constant 0.000000e+00 : f32
    %7 = vector.broadcast %cst : f32 to vector<40x128xf32>
    %8 = arith.cmpf ogt, %6, %7 : vector<40x128xf32>
    %cst_5 = arith.constant 2.000000e-01 : f32
    %9 = vector.broadcast %cst_5 : f32 to vector<40x128xf32>
    %10 = arith.mulf %9, %6 : vector<40x128xf32>
    %11 = arith.select %8, %6, %10 : vector<40x128xi1>, vector<40x128xf32>
    %c0_6 = arith.constant 0 : index
    %c0_7 = arith.constant 0 : index
    %12 = vector.load %arg4[%c0_6, %c0_7] : memref<40x128xf32, #tpu.memory_space<vmem>>, vector<40x128xf32>
    tpu.vector_store %arg4[%c0_6, %c0_7], %11 {strides = array<i32>} : memref<40x128xf32, #tpu.memory_space<vmem>>, vector<40x128xf32>,
    return
  }
  func.func @transform_0(%arg0: i32) -> (i32, i32) {
    %c0_i32 = arith.constant 0 : i32
    %c0_i32_0 = arith.constant 0 : i32
    return %arg0, %c0_i32 : i32, i32
  }
  func.func @transform_1(%arg0: i32) -> (i32, i32) {
    %c0_i32 = arith.constant 0 : i32
    %c0_i32_0 = arith.constant 0 : i32
    %c0_i32_1 = arith.constant 0 : i32
    return %c0_i32, %c0_i32_0 : i32, i32
  }
  func.func @transform_2(%arg0: i32) -> (i32, i32) {
    %c0_i32 = arith.constant 0 : i32
    %c0_i32_0 = arith.constant 0 : i32
    %c0_i32_1 = arith.constant 0 : i32
    return %c0_i32, %c0_i32_0 : i32, i32
  }
  func.func @transform_3(%arg0: i32) -> (i32, i32) {
    %c0_i32 = arith.constant 0 : i32
    %c0_i32_0 = arith.constant 0 : i32
    return %arg0, %c0_i32 : i32, i32
  }
}

module attributes {stable_mosaic.version = 11 : i64} {
  func.func @conv_stats_kernel(%arg0: i32, %arg1: memref<48x128xf32, #tpu.memory_space<vmem>>, %arg2: memref<3x128x128xf32, #tpu.memory_space<vmem>>, %arg3: memref<1x128xf32, #tpu.memory_space<vmem>>, %arg4: memref<40x1xf32, #tpu.memory_space<vmem>>, %arg5: memref<40x128xf32, #tpu.memory_space<vmem>>, %arg6: memref<1x128xf32, #tpu.memory_space<vmem>>, %arg7: memref<1x128xf32, #tpu.memory_space<vmem>>) attributes {dimension_semantics = [#tpu.dimension_semantics<arbitrary>], iteration_bounds = array<i64: 1>, scalar_prefetch = 0 : i64, scratch_operands = 0 : i64, tpu.core_type = #tpu.core_type<tc>, window_params = [{pipeline_mode = #tpu.pipeline_mode<synchronous>, transform_indices = @transform_0, window_bounds = array<i64: 48, 128>}, {pipeline_mode = #tpu.pipeline_mode<synchronous>, transform_indices = @transform_1, window_bounds = array<i64: 3, 128, 128>}, {pipeline_mode = #tpu.pipeline_mode<synchronous>, transform_indices = @transform_2, window_bounds = array<i64: 1, 128>}, {transform_indices = @transform_3, window_bounds = array<i64: 40, 1>}, {transform_indices = @transform_4, window_bounds = array<i64: 40, 128>}, {pipeline_mode = #tpu.pipeline_mode<synchronous>, transform_indices = @transform_5, window_bounds = array<i64: 1, 128>}, {pipeline_mode = #tpu.pipeline_mode<synchronous>, transform_indices = @transform_6, window_bounds = array<i64: 1, 128>}]} {
    %c40_i32 = arith.constant 40 : i32
    %0 = arith.muli %arg0, %c40_i32 : i32
    %1 = tpu.assume_multiple %0, 8 : i32
    %2 = arith.index_cast %1 : i32 to index
    %c0 = arith.constant 0 : index
    %3 = vector.load %arg1[%2, %c0] : memref<48x128xf32, #tpu.memory_space<vmem>>, vector<48x128xf32>
    %cst = arith.constant 0.000000e+00 : f32
    %4 = vector.broadcast %cst : f32 to vector<40x128xf32>
    %5 = vector.extract_strided_slice %3 {offsets = [0, 0], sizes = [40, 128], strides = [1, 1]} : vector<48x128xf32> to vector<40x128xf32>
    %c0_0 = arith.constant 0 : index
    %c0_1 = arith.constant 0 : index
    %c0_2 = arith.constant 0 : index
    %6 = vector.load %arg2[%c0_0, %c0_1, %c0_2] : memref<3x128x128xf32, #tpu.memory_space<vmem>>, vector<1x128x128xf32>
    %7 = vector.shape_cast %6 : vector<1x128x128xf32> to vector<128x128xf32>
    %cst_3 = arith.constant dense<0.000000e+00> : vector<40x128xf32>
    %8 = tpu.matmul %5, %7, %cst_3 {dimension_numbers = #tpu.dot_dimension_numbers<[1], [0], [0], [1], [0, 0, 1, 1], [], []>} : vector<40x128xf32>, vector<128x128xf32>, vector<40x128xf32> -> vector<40x128xf32>
    %9 = arith.addf %4, %8 : vector<40x128xf32>
    %10 = vector.extract_strided_slice %3 {offsets = [1, 0], sizes = [40, 128], strides = [1, 1]} : vector<48x128xf32> to vector<40x128xf32>
    %c1 = arith.constant 1 : index
    %c0_4 = arith.constant 0 : index
    %c0_5 = arith.constant 0 : index
    %11 = vector.load %arg2[%c1, %c0_4, %c0_5] : memref<3x128x128xf32, #tpu.memory_space<vmem>>, vector<1x128x128xf32>
    %12 = vector.shape_cast %11 : vector<1x128x128xf32> to vector<128x128xf32>
    %cst_6 = arith.constant dense<0.000000e+00> : vector<40x128xf32>
    %13 = tpu.matmul %10, %12, %cst_6 {dimension_numbers = #tpu.dot_dimension_numbers<[1], [0], [0], [1], [0, 0, 1, 1], [], []>} : vector<40x128xf32>, vector<128x128xf32>, vector<40x128xf32> -> vector<40x128xf32>
    %14 = arith.addf %9, %13 : vector<40x128xf32>
    %15 = vector.extract_strided_slice %3 {offsets = [2, 0], sizes = [40, 128], strides = [1, 1]} : vector<48x128xf32> to vector<40x128xf32>
    %c2 = arith.constant 2 : index
    %c0_7 = arith.constant 0 : index
    %c0_8 = arith.constant 0 : index
    %16 = vector.load %arg2[%c2, %c0_7, %c0_8] : memref<3x128x128xf32, #tpu.memory_space<vmem>>, vector<1x128x128xf32>
    %17 = vector.shape_cast %16 : vector<1x128x128xf32> to vector<128x128xf32>
    %cst_9 = arith.constant dense<0.000000e+00> : vector<40x128xf32>
    %18 = tpu.matmul %15, %17, %cst_9 {dimension_numbers = #tpu.dot_dimension_numbers<[1], [0], [0], [1], [0, 0, 1, 1], [], []>} : vector<40x128xf32>, vector<128x128xf32>, vector<40x128xf32> -> vector<40x128xf32>
    %19 = arith.addf %14, %18 : vector<40x128xf32>
    %c0_10 = arith.constant 0 : index
    %c0_11 = arith.constant 0 : index
    %20 = vector.load %arg3[%c0_10, %c0_11] : memref<1x128xf32, #tpu.memory_space<vmem>>, vector<1x128xf32>
    %21 = vector.broadcast %20 : vector<1x128xf32> to vector<40x128xf32>
    %22 = arith.addf %19, %21 : vector<40x128xf32>
    %c0_12 = arith.constant 0 : index
    %c0_13 = arith.constant 0 : index
    %23 = vector.load %arg5[%c0_12, %c0_13] : memref<40x128xf32, #tpu.memory_space<vmem>>, vector<40x128xf32>
    tpu.vector_store %arg5[%c0_12, %c0_13], %22 {strides = array<i32>} : memref<40x128xf32, #tpu.memory_space<vmem>>, vector<40x128xf32>,
    %c0_i32 = arith.constant 0 : i32
    %24 = arith.cmpi eq, %arg0, %c0_i32 : i32
    %25 = arith.extui %24 : i1 to i32
    %c0_i32_14 = arith.constant 0 : i32
    %26 = arith.cmpi ne, %25, %c0_i32_14 : i32
    scf.if %26 {
      %cst_27 = arith.constant 0.000000e+00 : f32
      %41 = vector.broadcast %cst_27 : f32 to vector<1x128xf32>
      %c0_28 = arith.constant 0 : index
      %c0_29 = arith.constant 0 : index
      %42 = vector.load %arg6[%c0_28, %c0_29] : memref<1x128xf32, #tpu.memory_space<vmem>>, vector<1x128xf32>
      tpu.vector_store %arg6[%c0_28, %c0_29], %41 {strides = array<i32>} : memref<1x128xf32, #tpu.memory_space<vmem>>, vector<1x128xf32>,
      %cst_30 = arith.constant 0.000000e+00 : f32
      %43 = vector.broadcast %cst_30 : f32 to vector<1x128xf32>
      %c0_31 = arith.constant 0 : index
      %c0_32 = arith.constant 0 : index
      %44 = vector.load %arg7[%c0_31, %c0_32] : memref<1x128xf32, #tpu.memory_space<vmem>>, vector<1x128xf32>
      tpu.vector_store %arg7[%c0_31, %c0_32], %43 {strides = array<i32>} : memref<1x128xf32, #tpu.memory_space<vmem>>, vector<1x128xf32>,
    } else {
    }
    %c0_15 = arith.constant 0 : index
    %c0_16 = arith.constant 0 : index
    %27 = vector.load %arg4[%c0_15, %c0_16] : memref<40x1xf32, #tpu.memory_space<vmem>>, vector<40x1xf32>
    %28 = vector.broadcast %27 : vector<40x1xf32> to vector<40x128xf32>
    %29 = arith.mulf %22, %28 : vector<40x128xf32>
    %c0_17 = arith.constant 0 : index
    %c0_18 = arith.constant 0 : index
    %30 = vector.load %arg6[%c0_17, %c0_18] : memref<1x128xf32, #tpu.memory_space<vmem>>, vector<1x128xf32>
    %cst_19 = arith.constant dense<0.000000e+00> : vector<128xf32>
    %31 = vector.multi_reduction <add>, %29, %cst_19 [0] : vector<40x128xf32> to vector<128xf32>
    %32 = vector.shape_cast %31 : vector<128xf32> to vector<1x128xf32>
    %33 = arith.addf %30, %32 : vector<1x128xf32>
    %c0_20 = arith.constant 0 : index
    %c0_21 = arith.constant 0 : index
    %34 = vector.load %arg6[%c0_20, %c0_21] : memref<1x128xf32, #tpu.memory_space<vmem>>, vector<1x128xf32>
    tpu.vector_store %arg6[%c0_20, %c0_21], %33 {strides = array<i32>} : memref<1x128xf32, #tpu.memory_space<vmem>>, vector<1x128xf32>,
    %c0_22 = arith.constant 0 : index
    %c0_23 = arith.constant 0 : index
    %35 = vector.load %arg7[%c0_22, %c0_23] : memref<1x128xf32, #tpu.memory_space<vmem>>, vector<1x128xf32>
    %36 = arith.mulf %29, %22 : vector<40x128xf32>
    %cst_24 = arith.constant dense<0.000000e+00> : vector<128xf32>
    %37 = vector.multi_reduction <add>, %36, %cst_24 [0] : vector<40x128xf32> to vector<128xf32>
    %38 = vector.shape_cast %37 : vector<128xf32> to vector<1x128xf32>
    %39 = arith.addf %35, %38 : vector<1x128xf32>
    %c0_25 = arith.constant 0 : index
    %c0_26 = arith.constant 0 : index
    %40 = vector.load %arg7[%c0_25, %c0_26] : memref<1x128xf32, #tpu.memory_space<vmem>>, vector<1x128xf32>
    tpu.vector_store %arg7[%c0_25, %c0_26], %39 {strides = array<i32>} : memref<1x128xf32, #tpu.memory_space<vmem>>, vector<1x128xf32>,
    return
  }
  func.func @transform_0(%arg0: i32) -> (i32, i32) {
    %c0_i32 = arith.constant 0 : i32
    %c0_i32_0 = arith.constant 0 : i32
    %c0_i32_1 = arith.constant 0 : i32
    return %c0_i32, %c0_i32_0 : i32, i32
  }
  func.func @transform_1(%arg0: i32) -> (i32, i32, i32) {
    %c0_i32 = arith.constant 0 : i32
    %c0_i32_0 = arith.constant 0 : i32
    %c0_i32_1 = arith.constant 0 : i32
    %c0_i32_2 = arith.constant 0 : i32
    return %c0_i32, %c0_i32_0, %c0_i32_1 : i32, i32, i32
  }
  func.func @transform_2(%arg0: i32) -> (i32, i32) {
    %c0_i32 = arith.constant 0 : i32
    %c0_i32_0 = arith.constant 0 : i32
    %c0_i32_1 = arith.constant 0 : i32
    return %c0_i32, %c0_i32_0 : i32, i32
  }
  func.func @transform_3(%arg0: i32) -> (i32, i32) {
    %c0_i32 = arith.constant 0 : i32
    %c0_i32_0 = arith.constant 0 : i32
    return %arg0, %c0_i32 : i32, i32
  }
  func.func @transform_4(%arg0: i32) -> (i32, i32) {
    %c0_i32 = arith.constant 0 : i32
    %c0_i32_0 = arith.constant 0 : i32
    return %arg0, %c0_i32 : i32, i32
  }
  func.func @transform_5(%arg0: i32) -> (i32, i32) {
    %c0_i32 = arith.constant 0 : i32
    %c0_i32_0 = arith.constant 0 : i32
    %c0_i32_1 = arith.constant 0 : i32
    return %c0_i32, %c0_i32_0 : i32, i32
  }
  func.func @transform_6(%arg0: i32) -> (i32, i32) {
    %c0_i32 = arith.constant 0 : i32
    %c0_i32_0 = arith.constant 0 : i32
    %c0_i32_1 = arith.constant 0 : i32
    return %c0_i32, %c0_i32_0 : i32, i32
  }
}

</mosaic_0001>

<bundles_post_ra>
// kernel: tile.18
= control target key start
LH: loop header
LB: loop body
LE: loop exit
PB: predicated region body
PF: predicated region fallthrough
CT: control target
= control target key end

     0   :  { %s28_s0 = inlined_call_operand.vmem [shape: f32[8], index: 0, kind: input, shape index: {}]   ;;  %s29_s1 = inlined_call_operand.vmem [shape: f32[16,8], index: 1, kind: output, shape index: {}]  }
   0x1   :  { %v4_v0 = vld [vmem:[%s28_s0] ss:$0 sm:$0xff] }
   0x2   :  { %5 = vst [vmem:[%s29_s1] sm:$0xff] %v4_v0  ;;  %8 = vst [vmem:[%s29_s1 + $0x8] sm:$0xff] %v4_v0 }

// kernel: tile.19
= control target key start
LH: loop header
LB: loop body
LE: loop exit
PB: predicated region body
PF: predicated region fallthrough
CT: control target
= control target key end

     0   :  { %s131_s10 = smov 120   ;;  %s132_s11 = smov 104   ;;  %vm3_vm0 = vcmask 64512   ;;  %vm9_vm1 = vcmask 1048512   ;;  %vm15_vm2 = vcmask 982912   ;;  %vm21_vm3 = vcmask 917312   ;;  %s207_s0 = inlined_call_operand.vmem [shape: f32[16,8], index: 0, kind: input, shape index: {}]   ;;  %s208_s1 = inlined_call_operand.vmem [shape: f32[1,128], index: 1, kind: output, shape index: {}]  }
   0x1   :  { %v101_v0 = vld [vmem:[%s207_s0 + $0xf] sm:$0x1]   ;;  %v103_v1 = vld [vmem:[%s207_s0 + $0xd] sm:$0x1]   ;;  %v102_v2 = vld [vmem:[%s207_s0 + $0xe] sm:$0x1]  }
   0x2   :  { %7 = vrot.lane.b32.xlu0 %v101_v0, %s131_s10  ;;  %19 = vrot.lane.b32.xlu1 %v103_v1, %s132_s11  ;;  %v104_v3 = vld [vmem:[%s207_s0 + $0xc] sm:$0x1]   ;;  %s133_s16 = smov 112   ;;  %s134_s17 = smov 96   ;;  %v105_v4 = vld [vmem:[%s207_s0 + $0xb] sm:$0x1]  }
   0x3   :  { %v106_v5 = vld [vmem:[%s207_s0 + $0xa] sm:$0x1]   ;;  %v2_v6 = vld [vmem:[%s207_s0] sm:$0x1]   ;;  %s135_s24 = smov 88   ;;  %s136_s25 = smov 80  }
   0x4   :  { %4 = vst.msk [vmem:[#allocation0] sm:$0x1] %vm3_vm0, %v2_v6   ;;  %v107_v7 = vld [vmem:[%s207_s0 + $0x9] sm:$0x1]   ;;  %v108_v8 = vld [vmem:[%s207_s0 + $0x8] sm:$0x1]  }
   0x5   :  { %s137_s30 = smov 72   ;;  %s138_s2 = smov 64   ;;  %v109_v9 = vld [vmem:[%s207_s0 + $0x7] sm:$0x1]   ;;  %v110_v10 = vld [vmem:[%s207_s0 + $0x6] sm:$0x1]  }
   0x6   :  { %13 = vrot.lane.b32.xlu0 %v102_v2, %s133_s16  ;;  %25 = vrot.lane.b32.xlu1 %v104_v3, %s134_s17  ;;  %s139_s7 = smov 56   ;;  %s140_s8 = smov 48   ;;  %v111_v11 = vld [vmem:[%s207_s0 + $0x5] sm:$0x1]   ;;  %v112_v12 = vld [vmem:[%s207_s0 + $0x4] sm:$0x1]  }
   0x7   :  { %s141_s13 = smov 40   ;;  %s142_s14 = smov 32   ;;  %v113_v13 = vld [vmem:[%s207_s0 + $0x3] sm:$0x1]   ;;  %v114_v14 = vld [vmem:[%s207_s0 + $0x2] sm:$0x1]  }
   0x8   :  { %s143_s19 = smov 24   ;;  %s144_s20 = smov 16   ;;  %v115_v15 = vld [vmem:[%s207_s0 + $0x1] sm:$0x1]   ;;  %vm27_vm4 = vcmask 851712   ;;  %vm33_vm5 = vcmask 786112  }
   0x9   :  { %s145_s0 = smov 8   ;;  %vm39_vm6 = vcmask 720512   ;;  %vm45_vm7 = vcmask 654912   ;;  %vm51_vm8 = vcmask 589312   ;;  %vm57_vm9 = vcmask 523712  }
   0xa   :  { %31 = vrot.lane.b32.xlu0 %v105_v4, %s135_s24  ;;  %37 = vrot.lane.b32.xlu1 %v106_v5, %s136_s25  ;;  %vm63_vm10 = vcmask 458112   ;;  %vm69_vm11 = vcmask 392512   ;;  %vm75_vm12 = vcmask 326912   ;;  %vm81_vm13 = vcmask 261312  }
   0xb   :  { %vm87_vm14 = vcmask 195712   ;;  %vm93_vm15 = vcmask 130112  }
   0xe   :  { %43 = vrot.lane.b32.xlu0 %v107_v7, %s137_s30  ;;  %49 = vrot.lane.b32.xlu1 %v108_v8, %s138_s2 }
  0x12   :  { %55 = vrot.lane.b32.xlu0 %v109_v9, %s139_s7  ;;  %61 = vrot.lane.b32.xlu1 %v110_v10, %s140_s8 }
  0x16   :  { %67 = vrot.lane.b32.xlu0 %v111_v11, %s141_s13  ;;  %73 = vrot.lane.b32.xlu1 %v112_v12, %s142_s14 }
  0x1a   :  { %79 = vrot.lane.b32.xlu0 %v113_v13, %s143_s19  ;;  %85 = vrot.lane.b32.xlu1 %v114_v14, %s144_s20 }
  0x1e   :  { %91 = vrot.lane.b32.xlu0 %v115_v15, %s145_s0 }
  0x74   :  { %v8_v16 = vpop.permute.xlu0 %7   ;;  %v20_v17 = vpop.permute.xlu1 %19  }
  0x75   :  { %10 = vst.msk [vmem:[#allocation0] sm:$0x1] %vm9_vm1, %v8_v16  }
  0x78   :  { %v14_v18 = vpop.permute.xlu0 %13   ;;  %v26_v19 = vpop.permute.xlu1 %25  }
  0x79   :  { %16 = vst.msk [vmem:[#allocation0] sm:$0x1] %vm15_vm2, %v14_v18  }
  0x7a   :  { %22 = vst.msk [vmem:[#allocation0] sm:$0x1] %vm21_vm3, %v20_v17  }
  0x7b   :  { %28 = vst.msk [vmem:[#allocation0] sm:$0x1] %vm27_vm4, %v26_v19  }
  0x7c   :  { %v32_v20 = vpop.permute.xlu0 %31   ;;  %v38_v21 = vpop.permute.xlu1 %37  }
  0x7d   :  { %34 = vst.msk [vmem:[#allocation0] sm:$0x1] %vm33_vm5, %v32_v20  }
  0x7e   :  { %40 = vst.msk [vmem:[#allocation0] sm:$0x1] %vm39_vm6, %v38_v21  }
  0x80   :  { %v44_v22 = vpop.permute.xlu0 %43   ;;  %v50_v23 = vpop.permute.xlu1 %49  }
  0x81   :  { %46 = vst.msk [vmem:[#allocation0] sm:$0x1] %vm45_vm7, %v44_v22  }
  0x82   :  { %52 = vst.msk [vmem:[#allocation0] sm:$0x1] %vm51_vm8, %v50_v23  }
  0x84   :  { %v56_v24 = vpop.permute.xlu0 %55   ;;  %v62_v25 = vpop.permute.xlu1 %61  }
  0x85   :  { %58 = vst.msk [vmem:[#allocation0] sm:$0x1] %vm57_vm9, %v56_v24  }
  0x86   :  { %64 = vst.msk [vmem:[#allocation0] sm:$0x1] %vm63_vm10, %v62_v25  }
  0x88   :  { %v68_v26 = vpop.permute.xlu0 %67   ;;  %v74_v27 = vpop.permute.xlu1 %73  }
  0x89   :  { %70 = vst.msk [vmem:[#allocation0] sm:$0x1] %vm69_vm11, %v68_v26  }
  0x8a   :  { %76 = vst.msk [vmem:[#allocation0] sm:$0x1] %vm75_vm12, %v74_v27  }
  0x8c   :  { %v80_v28 = vpop.permute.xlu0 %79   ;;  %v86_v29 = vpop.permute.xlu1 %85  }
  0x8d   :  { %82 = vst.msk [vmem:[#allocation0] sm:$0x1] %vm81_vm13, %v80_v28  }
  0x8e   :  { %88 = vst.msk [vmem:[#allocation0] sm:$0x1] %vm87_vm14, %v86_v29  }
  0x90   :  { %v92_v30 = vpop.permute.xlu0 %91  }
  0x91   :  { %94 = vst.msk [vmem:[#allocation0] sm:$0x1] %vm93_vm15, %v92_v30  }
  0x98   :  { %v98_v31 = vld [vmem:[#allocation0] sm:$0x1] }
  0x99   :  { %100 = vst [vmem:[%s208_s1] sm:$0x1] %v98_v31 }

// kernel: conv_bn_lrelu.3
= control target key start
LH: loop header
LB: loop body
LE: loop exit
PB: predicated region body
PF: predicated region fallthrough
CT: control target
= control target key end

     0   :  { %s125_s0 = inlined_call_operand.vmem [shape: f32[40,128], index: 0, kind: input, shape index: {}, may-alias: {0,3}]   ;;  %s126_s1 = inlined_call_operand.vmem [shape: f32[1,128], index: 1, kind: input, shape index: {}]   ;;  %s127_s2 = inlined_call_operand.vmem [shape: f32[1,128], index: 2, kind: input, shape index: {}]   ;;  %s128_s3 = inlined_call_operand.vmem [shape: f32[40,128], index: 3, kind: output, shape index: {}, may-alias: {0,3}]  }
   0x1   :  { %v14_v0 = vld [vmem:[%s125_s0] sm:$0xff]  ;;  %v15_v4 = vld [vmem:[%s125_s0 + $0x8] sm:$0xff]  ;;  %v16_v5 = vld [vmem:[%s125_s0 + $0x10] sm:$0xff] }
   0x2   :  { %v67_v1 = vld [vmem:[%s126_s1] ss:$0 sm:$0xff]  ;;  %v17_v6 = vld [vmem:[%s125_s0 + $0x18] sm:$0xff] }
   0x3   :  { %v68_v2 = vld [vmem:[%s127_s2] ss:$0 sm:$0xff]  ;;  %v26_v3 = vmul.f32 %v67_v1, %v14_v0  ;;  %v27_v7 = vmul.f32 %v67_v1, %v15_v4  ;;  %v28_v8 = vmul.f32 %v67_v1, %v16_v5  ;;  %v29_v9 = vmul.f32 %v67_v1, %v17_v6 }
   0x4   :  { %v18_v10 = vld [vmem:[%s125_s0 + $0x20] sm:$0xff] }
   0x5   :  { %v38_v11 = vadd.f32 %v68_v2, %v26_v3  ;;  %v30_v12 = vmul.f32 %v67_v1, %v18_v10  ;;  %v39_v13 = vadd.f32 %v68_v2, %v27_v7  ;;  %v40_v14 = vadd.f32 %v68_v2, %v28_v8 }
   0x6   :  { %v41_v15 = vadd.f32 %v68_v2, %v29_v9 }
   0x7   :  { %vm43_vm0 = vcmp.gt.f32.partialorder %v38_v11, 0.0  ;;  %v48_v16 = vmul.f32 0.2, %v38_v11  ;;  %v42_v17 = vadd.f32 %v68_v2, %v30_v12  ;;  %vm44_vm1 = vcmp.gt.f32.partialorder %v39_v13, 0.0 }
   0x8   :  { %v49_v18 = vmul.f32 0.2, %v39_v13  ;;  %vm45_vm2 = vcmp.gt.f32.partialorder %v40_v14, 0.0  ;;  %v50_v19 = vmul.f32 0.2, %v40_v14  ;;  %vm46_vm3 = vcmp.gt.f32.partialorder %v41_v15, 0.0 }
   0x9   :  { %v53_v20 = vsel %vm43_vm0, %v38_v11, %v48_v16  ;;  %v51_v21 = vmul.f32 0.2, %v41_v15  ;;  %vm47_vm4 = vcmp.gt.f32.partialorder %v42_v17, 0.0  ;;  %v52_v24 = vmul.f32 0.2, %v42_v17 }
   0xa   :  { %58 = vst [vmem:[%s128_s3] sm:$0xff] %v53_v20  ;;  %v54_v22 = vsel %vm44_vm1, %v39_v13, %v49_v18  ;;  %v55_v23 = vsel %vm45_vm2, %v40_v14, %v50_v19 }
   0xb   :  { %59 = vst [vmem:[%s128_s3 + $0x8] sm:$0xff] %v54_v22  ;;  %60 = vst [vmem:[%s128_s3 + $0x10] sm:$0xff] %v55_v23  ;;  %v56_v25 = vsel %vm46_vm3, %v41_v15, %v51_v21  ;;  %v57_v26 = vsel %vm47_vm4, %v42_v17, %v52_v24 }
   0xc   :  { %61 = vst [vmem:[%s128_s3 + $0x18] sm:$0xff] %v56_v25  ;;  %62 = vst [vmem:[%s128_s3 + $0x20] sm:$0xff] %v57_v26 }

// kernel: conv_bn_lrelu.2
= control target key start
LH: loop header
LB: loop body
LE: loop exit
PB: predicated region body
PF: predicated region fallthrough
CT: control target
= control target key end

     0   :  { %v825_v0 = vmov 0.0|0.0   ;;  %vm826_vm0 = vmmov 0   ;;  %v827_v8 = vmov 0.0   ;;  %v828_v12 = vmov 0   ;;  %s1180_s1 = inlined_call_operand.vmem [shape: f32[3,128,128], index: 1, kind: input, shape index: {}]   ;;  %s1181_s3 = inlined_call_operand.vmem [shape: f32[40,1], index: 3, kind: input, shape index: {}]   ;;  %s1182_s0 = inlined_call_operand.vmem [shape: f32[48,128], index: 0, kind: input, shape index: {}]   ;;  %s1183_s5 = inlined_call_operand.vmem [shape: f32[1,128], index: 5, kind: output, shape index: {1}]   ;;  %s1184_s6 = inlined_call_operand.vmem [shape: f32[1,128], index: 6, kind: output, shape index: {2}]   ;;  %s1185_s2 = inlined_call_operand.vmem [shape: f32[1,128], index: 2, kind: input, shape index: {}]   ;;  %s1186_s4 = inlined_call_operand.vmem [shape: f32[40,128], index: 4, kind: output, shape index: {0}]  }
   0x1   :  { %731 = vmatprep.subr.bf16.mxu0 %v825_v0  ;;  %755 = vmatprep.subr.bf16.mxu1 %v825_v0  ;;  %v494_v1 = vld [vmem:[%s1180_s1 + $0x80] sm:$0xff]  ;;  %v495_v2 = vld [vmem:[%s1180_s1 + $0x88] sm:$0xff]  ;;  %v496_v6 = vld [vmem:[%s1180_s1 + $0x90] sm:$0xff]  ;;  %vm67_vm1 = vcmask 1046528   ;;  %vm281_vm2 = vcmask 1045504   ;;  %414 = vst [vmem:[%s1183_s5] sm:$0x1] %v827_v8 }
   0x2   :  { %v28_v3 = vld [vmem:[%s1180_s1] sm:$0xff]  ;;  %v732_v4 = vpack.c.bf16 %v495_v2, %v494_v1  ;;  %v29_v5 = vld [vmem:[%s1180_s1 + $0x8] sm:$0xff]  ;;  %v497_v7 = vld [vmem:[%s1180_s1 + $0x98] sm:$0xff]  ;;  %622 = vmatprep.mubr.msk.f32.mxu0 %vm826_vm0, %v827_v8  ;;  %669 = vmatprep.mubr.msk.f32.mxu1 %vm826_vm0, %v827_v8  ;;  %415 = vst [vmem:[%s1184_s6] sm:$0x1] %v827_v8 }
   0x3   :  { %v756_v9 = vpack.c.bf16 %v29_v5, %v28_v3  ;;  %v30_v10 = vld [vmem:[%s1180_s1 + $0x10] sm:$0xff]  ;;  %v31_v11 = vld [vmem:[%s1180_s1 + $0x18] sm:$0xff]  ;;  %823 = vset.pattern.permute.xlu0 %v828_v12  ;;  %824 = vset.pattern.permute.xlu1 %v828_v12  ;;  %v735_v13 = vpack.c.bf16 %v497_v7, %v496_v6  ;;  %v498_v15 = vld [vmem:[%s1180_s1 + $0xa0] sm:$0xff] }
   0x4   :  { %733 = vmatpush3.bf16.msra.mxu0 %v732_v4  ;;  %v759_v14 = vpack.c.bf16 %v31_v11, %v30_v10  ;;  %v499_v16 = vld [vmem:[%s1180_s1 + $0xa8] sm:$0xff]  ;;  %v32_v17 = vld [vmem:[%s1180_s1 + $0x20] sm:$0xff]  ;;  %v500_v21 = vld [vmem:[%s1180_s1 + $0xb0] sm:$0xff] }
   0x5   :  { %757 = vmatpush3.bf16.msra.mxu1 %v756_v9  ;;  %734 = vmatprep.subr.bf16.mxu0 %v825_v0  ;;  %v33_v18 = vld [vmem:[%s1180_s1 + $0x28] sm:$0xff]  ;;  %v738_v19 = vpack.c.bf16 %v499_v16, %v498_v15  ;;  %v501_v22 = vld [vmem:[%s1180_s1 + $0xb8] sm:$0xff]  ;;  %v34_v23 = vld [vmem:[%s1180_s1 + $0x30] sm:$0xff] }
   0x6   :  { %758 = vmatprep.subr.bf16.mxu1 %v825_v0  ;;  %v762_v20 = vpack.c.bf16 %v33_v18, %v32_v17  ;;  %v35_v24 = vld [vmem:[%s1180_s1 + $0x38] sm:$0xff]  ;;  %v741_v25 = vpack.c.bf16 %v501_v22, %v500_v21  ;;  %v502_v27 = vld [vmem:[%s1180_s1 + $0xc0] sm:$0xff]  ;;  %v503_v28 = vld [vmem:[%s1180_s1 + $0xc8] sm:$0xff] }
   0x7   :  { %v765_v26 = vpack.c.bf16 %v35_v24, %v34_v23  ;;  %v36_v29 = vld [vmem:[%s1180_s1 + $0x40] sm:$0xff]  ;;  %v37_v30 = vld [vmem:[%s1180_s1 + $0x48] sm:$0xff]  ;;  %v744_v31 = vpack.c.bf16 %v503_v28, %v502_v27  ;;  %v504_v33 = vld [vmem:[%s1180_s1 + $0xd0] sm:$0xff] }
   0x8   :  { %736 = vmatpush3.bf16.msra.mxu0 %v735_v13  ;;  %v768_v32 = vpack.c.bf16 %v37_v30, %v36_v29  ;;  %v505_v34 = vld [vmem:[%s1180_s1 + $0xd8] sm:$0xff]  ;;  %v38_v35 = vld [vmem:[%s1180_s1 + $0x50] sm:$0xff]  ;;  %v416_v37 = vld [vmem:[%s1181_s3] sm:$0xff] }
   0x9   :  { %760 = vmatpush3.bf16.msra.mxu1 %v759_v14  ;;  %737 = vmatprep.subr.bf16.mxu0 %v825_v0  ;;  %v39_v36 = vld [vmem:[%s1180_s1 + $0x58] sm:$0xff]  ;;  %v418_v38 = vld [vmem:[%s1181_s3 + $0x10] sm:$0xff]  ;;  %v747_v39 = vpack.c.bf16 %v505_v34, %v504_v33  ;;  %v506_v41 = vld [vmem:[%s1180_s1 + $0xe0] sm:$0xff] }
   0xa   :  { %761 = vmatprep.subr.bf16.mxu1 %v825_v0  ;;  %423 = vperm.xlu0 %823, %v416_v37   ;;  %v771_v40 = vpack.c.bf16 %v39_v36, %v38_v35  ;;  %v507_v42 = vld [vmem:[%s1180_s1 + $0xe8] sm:$0xff]  ;;  %v40_v44 = vld [vmem:[%s1180_s1 + $0x60] sm:$0xff]  ;;  %v419_v46 = vld [vmem:[%s1181_s3 + $0x18] sm:$0xff] }
   0xb   :  { %v417_v43 = vld [vmem:[%s1181_s3 + $0x8] sm:$0xff]  ;;  %433 = vperm.xlu1 %824, %v418_v38   ;;  %v750_v47 = vpack.c.bf16 %v507_v42, %v506_v41  ;;  %v508_v48 = vld [vmem:[%s1180_s1 + $0xf0] sm:$0xff]  ;;  %v509_v49 = vld [vmem:[%s1180_s1 + $0xf8] sm:$0xff] }
   0xc   :  { %739 = vmatpush3.bf16.msra.mxu0 %v738_v19  ;;  %v41_v45 = vld [vmem:[%s1180_s1 + $0x68] sm:$0xff]  ;;  %v986_v51 = vld [vmem:[%s1182_s0] sm:$0xff]  ;;  %v42_v54 = vld [vmem:[%s1180_s1 + $0x70] sm:$0xff]  ;;  %v753_v56 = vpack.c.bf16 %v509_v49, %v508_v48 }
   0xd   :  { %763 = vmatpush3.bf16.msra.mxu1 %v762_v20  ;;  %740 = vmatprep.subr.bf16.mxu0 %v825_v0  ;;  %v774_v50 = vpack.c.bf16 %v41_v45, %v40_v44  ;;  %v991_v52 = vld [vmem:[%s1182_s0 + $0x8] sm:$0xff]  ;;  %v420_v53 = vld [vmem:[%s1181_s3 + $0x20] sm:$0xff]  ;;  %v43_v55 = vld [vmem:[%s1180_s1 + $0x78] sm:$0xff]  ;;  %v68_v57 = vrot.slane %v986_v51, 1  ;;  %v282_v35 = vrot.slane %v986_v51, 2 }
   0xe   :  { %764 = vmatprep.subr.bf16.mxu1 %v825_v0  ;;  %428 = vperm.xlu0 %823, %v417_v43   ;;  %v69_v58 = vrot.slane %v991_v52, 1  ;;  %v777_v59 = vpack.c.bf16 %v43_v55, %v42_v54  ;;  %v510_v60 = vld [vmem:[%s1180_s1 + $0x100] sm:$0xff]  ;;  %v511_v61 = vld [vmem:[%s1180_s1 + $0x108] sm:$0xff]  ;;  %v1015_v62 = vld [vmem:[%s1182_s0 + $0x10] sm:$0xff]  ;;  %v283_v36 = vrot.slane %v991_v52, 2 }
   0xf   :  { %438 = vperm.xlu1 %824, %v419_v46   ;;  %v780_v1 = vpack.c.bf16 %v511_v61, %v510_v60  ;;  %v71_v2 = vrot.slane %v1015_v62, 1  ;;  %v512_v3 = vld [vmem:[%s1180_s1 + $0x110] sm:$0xff]  ;;  %v513_v4 = vld [vmem:[%s1180_s1 + $0x118] sm:$0xff]  ;;  %v514_v10 = vld [vmem:[%s1180_s1 + $0x120] sm:$0xff] }
  0x10   :  { %742 = vmatpush3.bf16.msra.mxu0 %v741_v25  ;;  %v70_v63 = vsel %vm67_vm1, %v68_v57, %v69_v58  ;;  %v1030_v5 = vld [vmem:[%s1182_s0 + $0x18] sm:$0xff]  ;;  %v783_v6 = vpack.c.bf16 %v513_v4, %v512_v3  ;;  %v515_v11 = vld [vmem:[%s1180_s1 + $0x128] sm:$0xff]  ;;  %v1046_v12 = vld [vmem:[%s1182_s0 + $0x20] sm:$0xff] }
  0x11   :  { %766 = vmatpush3.bf16.msra.mxu1 %v765_v26  ;;  %743 = vmatprep.subr.bf16.mxu0 %v825_v0  ;;  %v72_v7 = vsel %vm67_vm1, %v69_v58, %v71_v2  ;;  %v73_v9 = vrot.slane %v1030_v5, 1  ;;  %v786_v13 = vpack.c.bf16 %v515_v11, %v514_v10  ;;  %v75_v15 = vrot.slane %v1046_v12, 1  ;;  %v516_v16 = vld [vmem:[%s1180_s1 + $0x130] sm:$0xff]  ;;  %v517_v17 = vld [vmem:[%s1180_s1 + $0x138] sm:$0xff]  ;;  %v1066_v18 = vld [vmem:[%s1182_s0 + $0x28] sm:$0xff] }
  0x12   :  { %767 = vmatprep.subr.bf16.mxu1 %v825_v0  ;;  %443 = vperm.xlu0 %823, %v420_v53   ;;  %v789_v19 = vpack.c.bf16 %v517_v17, %v516_v16  ;;  %v77_v21 = vrot.slane %v1066_v18, 1  ;;  %v518_v22 = vld [vmem:[%s1180_s1 + $0x140] sm:$0xff]  ;;  %v519_v23 = vld [vmem:[%s1180_s1 + $0x148] sm:$0xff]  ;;  %v520_v26 = vld [vmem:[%s1180_s1 + $0x150] sm:$0xff]  ;;  %v287_v37 = vrot.slane %v1030_v5, 2  ;;  %v289_v38 = vrot.slane %v1046_v12, 2 }
  0x13   :  { %v74_v14 = vsel %vm67_vm1, %v71_v2, %v73_v9  ;;  %v76_v20 = vsel %vm67_vm1, %v73_v9, %v75_v15  ;;  %v792_v24 = vpack.c.bf16 %v519_v23, %v518_v22  ;;  %v521_v27 = vld [vmem:[%s1180_s1 + $0x158] sm:$0xff]  ;;  %v522_v29 = vld [vmem:[%s1180_s1 + $0x160] sm:$0xff]  ;;  %v523_v30 = vld [vmem:[%s1180_s1 + $0x168] sm:$0xff]  ;;  %v291_v42 = vrot.slane %v1066_v18, 2 }
  0x14   :  { %745 = vmatpush3.bf16.msra.mxu0 %v744_v31  ;;  %v78_v25 = vsel %vm67_vm1, %v75_v15, %v77_v21  ;;  %v795_v28 = vpack.c.bf16 %v521_v27, %v520_v26  ;;  %v798_v31 = vpack.c.bf16 %v523_v30, %v522_v29  ;;  %v525_v33 = vld [vmem:[%s1180_s1 + $0x178] sm:$0xff]  ;;  %v290_v41 = vsel %vm281_vm2, %v287_v37, %v289_v38 }
  0x15   :  { %769 = vmatpush3.bf16.msra.mxu1 %v768_v32  ;;  %746 = vmatprep.subr.bf16.mxu0 %v825_v0  ;;  %v524_v32 = vld [vmem:[%s1180_s1 + $0x170] sm:$0xff] }
  0x16   :  { %770 = vmatprep.subr.bf16.mxu1 %v825_v0  ;;  %v801_v34 = vpack.c.bf16 %v525_v33, %v524_v32 }
  0x18   :  { %748 = vmatpush3.bf16.msra.mxu0 %v747_v39  ;;  %v284_v39 = vsel %vm281_vm2, %v282_v35, %v283_v36 }
  0x19   :  { %772 = vmatpush3.bf16.msra.mxu1 %v771_v40  ;;  %749 = vmatprep.subr.bf16.mxu0 %v825_v0  ;;  %v285_v40 = vrot.slane %v1015_v62, 2 }
  0x1a   :  { %773 = vmatprep.subr.bf16.mxu1 %v825_v0 }
  0x1b   :  { %v286_v43 = vsel %vm281_vm2, %v283_v36, %v285_v40  ;;  %v288_v44 = vsel %vm281_vm2, %v285_v40, %v287_v37 }
  0x1c   :  { %751 = vmatpush3.bf16.msra.mxu0 %v750_v47 }
  0x1d   :  { %775 = vmatpush3.bf16.msra.mxu1 %v774_v50  ;;  %752 = vmatprep.subr.bf16.mxu0 %v825_v0 }
  0x1e   :  { %776 = vmatprep.subr.bf16.mxu1 %v825_v0 }
  0x20   :  { %754 = vmatpush3.bf16.msra.mxu0 %v753_v56 }
  0x21   :  { %778 = vmatpush3.bf16.msra.mxu1 %v777_v59  ;;  %779 = vmatprep.subr.bf16.mxu0 %v825_v0 }
  0x22   :  { %803 = vmatprep.subr.bf16.mxu1 %v825_v0 }
  0x23   :  { %623 = vmatmul.mubr.f32.vlgmr.msra.gmra.mrb[0].mxu0 %v70_v63 }
  0x24   :  { %670 = vmatmul.mubr.f32.vlgmr.msra.gmra.mrb[0].mxu1 %v986_v51  ;;  %781 = vmatpush3.bf16.msra.mxu0 %v780_v1 }
  0x25   :  { %811 = vmatpush3.bf16.msra.mxu1 %v780_v1  ;;  %782 = vmatprep.subr.bf16.mxu0 %v825_v0 }
  0x26   :  { %804 = vmatprep.subr.bf16.mxu1 %v825_v0  ;;  %625 = vmatprep.mubr.msk.f32.mxu0 %vm826_vm0, %v827_v8 }
  0x27   :  { %626 = vmatmul.mubr.f32.gmra.mrb[2].mxu0 %v72_v7  ;;  %672 = vmatprep.mubr.msk.f32.mxu1 %vm826_vm0, %v827_v8  ;;  %v526_v7 = vld [vmem:[%s1185_s2] ss:$0 sm:$0xff] }
  0x28   :  { %784 = vmatpush3.bf16.msra.mxu0 %v783_v6  ;;  %673 = vmatmul.mubr.f32.gmra.mrb[2].mxu1 %v991_v52 }
  0x29   :  { %812 = vmatpush3.bf16.msra.mxu1 %v783_v6  ;;  %785 = vmatprep.subr.bf16.mxu0 %v825_v0 }
  0x2a   :  { %805 = vmatprep.subr.bf16.mxu1 %v825_v0  ;;  %628 = vmatprep.mubr.msk.f32.mxu0 %vm826_vm0, %v827_v8 }
  0x2b   :  { %629 = vmatmul.mubr.f32.gmra.mrb[4].mxu0 %v74_v14  ;;  %675 = vmatprep.mubr.msk.f32.mxu1 %vm826_vm0, %v827_v8 }
  0x2c   :  { %787 = vmatpush3.bf16.msra.mxu0 %v786_v13  ;;  %676 = vmatmul.mubr.f32.gmra.mrb[4].mxu1 %v1015_v62 }
  0x2d   :  { %813 = vmatpush3.bf16.msra.mxu1 %v786_v13  ;;  %788 = vmatprep.subr.bf16.mxu0 %v825_v0 }
  0x2e   :  { %806 = vmatprep.subr.bf16.mxu1 %v825_v0  ;;  %631 = vmatprep.mubr.msk.f32.mxu0 %vm826_vm0, %v827_v8 }
  0x2f   :  { %632 = vmatmul.mubr.f32.gmra.mrb[6].mxu0 %v76_v20  ;;  %678 = vmatprep.mubr.msk.f32.mxu1 %vm826_vm0, %v827_v8 }
  0x30   :  { %790 = vmatpush3.bf16.msra.mxu0 %v789_v19  ;;  %679 = vmatmul.mubr.f32.gmra.mrb[6].mxu1 %v1030_v5 }
  0x31   :  { %814 = vmatpush3.bf16.msra.mxu1 %v789_v19  ;;  %791 = vmatprep.subr.bf16.mxu0 %v825_v0 }
  0x32   :  { %807 = vmatprep.subr.bf16.mxu1 %v825_v0  ;;  %634 = vmatprep.mubr.msk.f32.mxu0 %vm826_vm0, %v827_v8 }
  0x33   :  { %635 = vmatmul.mubr.f32.gmra.mrb[8].mxu0 %v78_v25  ;;  %681 = vmatprep.mubr.msk.f32.mxu1 %vm826_vm0, %v827_v8 }
  0x34   :  { %793 = vmatpush3.bf16.msra.mxu0 %v792_v24  ;;  %682 = vmatmul.mubr.f32.gmra.mrb[8].mxu1 %v1046_v12 }
  0x35   :  { %815 = vmatpush3.bf16.msra.mxu1 %v792_v24  ;;  %794 = vmatprep.subr.bf16.mxu0 %v825_v0 }
  0x36   :  { %808 = vmatprep.subr.bf16.mxu1 %v825_v0  ;;  %716 = vmatprep.mubr.msk.f32.mxu0 %vm826_vm0, %v827_v8 }
  0x37   :  { %725 = vmatprep.mubr.msk.f32.mxu1 %vm826_vm0, %v827_v8 }
  0x38   :  { %796 = vmatpush3.bf16.msra.mxu0 %v795_v28 }
  0x39   :  { %816 = vmatpush3.bf16.msra.mxu1 %v795_v28  ;;  %797 = vmatprep.subr.bf16.mxu0 %v825_v0 }
  0x3a   :  { %809 = vmatprep.subr.bf16.mxu1 %v825_v0 }
  0x3c   :  { %799 = vmatpush3.bf16.msra.mxu0 %v798_v31 }
  0x3d   :  { %817 = vmatpush3.bf16.msra.mxu1 %v798_v31  ;;  %800 = vmatprep.subr.bf16.mxu0 %v825_v0 }
  0x3e   :  { %810 = vmatprep.subr.bf16.mxu1 %v825_v0  ;;  %v292_v0 = vsel %vm281_vm2, %v289_v38, %v291_v42 }
  0x40   :  { %802 = vmatpush3.bf16.msra.mxu0 %v801_v34 }
  0x41   :  { %818 = vmatpush3.bf16.msra.mxu1 %v801_v34 }
  0x43   :  { %717 = vmatmul.mubr.f32.vlgmr.msra.gmra.mrb[10].mxu0 %v284_v39 }
  0x44   :  { %726 = vmatmul.mubr.f32.vlgmr.msra.gmra.mrb[10].mxu1 %v290_v41  ;;  %719 = vmatprep.mubr.msk.f32.mxu0 %vm826_vm0, %v827_v8 }
  0x45   :  { %728 = vmatprep.mubr.msk.f32.mxu1 %vm826_vm0, %v827_v8 }
  0x47   :  { %720 = vmatmul.mubr.f32.gmra.mrb[12].mxu0 %v286_v43 }
  0x48   :  { %729 = vmatmul.mubr.f32.gmra.mrb[12].mxu1 %v292_v0  ;;  %722 = vmatprep.mubr.msk.f32.mxu0 %vm826_vm0, %v827_v8 }
  0x4b   :  { %723 = vmatmul.mubr.f32.gmra.mrb[14].mxu0 %v288_v44 }
  0x89   :  { %v424_v12 = vpop.permute.xlu0 %423 }
  0x8a   :  { %v434_v16 = vpop.permute.xlu1 %433 }
  0x8d   :  { %v429_v26 = vpop.permute.xlu0 %428 }
  0x8e   :  { %v439_v32 = vpop.permute.xlu1 %438 }
  0x91   :  { %v444_v40 = vpop.permute.xlu0 %443 }
  0xf6   :  { %v150_v45 = vpop.f32.mrb[0].mxu0 }
  0xf7   :  { %v624_v46 = vpop.f32.mrb[1].mxu0  ;;  %v240_v47 = vpop.f32.mrb[0].mxu1 }
  0xf8   :  { %v241_v48 = vadd.f32 %v240_v47, %v150_v45  ;;  %v671_v49 = vpop.f32.mrb[1].mxu1 }
  0xfa   :  { %v155_v50 = vpop.f32.mrb[2].mxu0 }
  0xfb   :  { %v627_v51 = vpop.f32.mrb[3].mxu0  ;;  %v245_v52 = vpop.f32.mrb[2].mxu1 }
  0xfc   :  { %v246_v53 = vadd.f32 %v245_v52, %v155_v50  ;;  %v674_v54 = vpop.f32.mrb[3].mxu1 }
  0xfe   :  { %v160_v55 = vpop.f32.mrb[4].mxu0 }
  0xff   :  { %v630_v56 = vpop.f32.mrb[5].mxu0  ;;  %v250_v57 = vpop.f32.mrb[4].mxu1 }
 0x100   :  { %v251_v58 = vadd.f32 %v250_v57, %v160_v55  ;;  %v677_v59 = vpop.f32.mrb[5].mxu1 }
 0x101   :  { %v451_v59 = vld [vmem:[%s1183_s5] sm:$0x1] }
 0x102   :  { %v165_v60 = vpop.f32.mrb[6].mxu0 }
 0x103   :  { %v633_v61 = vpop.f32.mrb[7].mxu0  ;;  %v255_v62 = vpop.f32.mrb[6].mxu1 }
 0x104   :  { %v256_v63 = vadd.f32 %v255_v62, %v165_v60  ;;  %v680_v8 = vpop.f32.mrb[7].mxu1  ;;  %v464_v62 = vld [vmem:[%s1184_s6] sm:$0x1] }
 0x106   :  { %v170_v1 = vpop.f32.mrb[8].mxu0 }
 0x107   :  { %v636_v2 = vpop.f32.mrb[9].mxu0  ;;  %v260_v3 = vpop.f32.mrb[8].mxu1 }
 0x108   :  { %v261_v4 = vadd.f32 %v260_v3, %v170_v1  ;;  %v683_v5 = vpop.f32.mrb[9].mxu1 }
 0x116   :  { %v364_v6 = vpop.f32.mrb[10].mxu0 }
 0x117   :  { %v388_v9 = vadd.f32 %v364_v6, %v241_v48  ;;  %v379_v10 = vpop.f32.mrb[10].mxu1  ;;  %v718_v11 = vpop.f32.mrb[11].mxu0 }
 0x118   :  { %v391_v13 = vadd.f32 %v379_v10, %v256_v63  ;;  %v727_v14 = vpop.f32.mrb[11].mxu1 }
 0x119   :  { %v400_v15 = vadd.f32 %v526_v7, %v388_v9 }
 0x11a   :  { %v403_v17 = vadd.f32 %v526_v7, %v391_v13  ;;  %v369_v18 = vpop.f32.mrb[12].mxu0 }
 0x11b   :  { %405 = vst [vmem:[%s1186_s4] sm:$0xff] %v400_v15  ;;  %v389_v19 = vadd.f32 %v369_v18, %v246_v53  ;;  %v384_v20 = vpop.f32.mrb[12].mxu1  ;;  %v721_v21 = vpop.f32.mrb[13].mxu0  ;;  %v446_v24 = vmul.f32 %v424_v12, %v400_v15 }
 0x11c   :  { %408 = vst [vmem:[%s1186_s4 + $0x18] sm:$0xff] %v403_v17  ;;  %v392_v22 = vadd.f32 %v384_v20, %v261_v4  ;;  %v730_v23 = vpop.f32.mrb[13].mxu1  ;;  %v449_v37 = vmul.f32 %v439_v32, %v403_v17 }
 0x11d   :  { %v401_v25 = vadd.f32 %v526_v7, %v389_v19  ;;  %v465_v33 = vmul.f32 %v446_v24, %v400_v15 }
 0x11e   :  { %v404_v27 = vadd.f32 %v526_v7, %v392_v22  ;;  %v374_v28 = vpop.f32.mrb[14].mxu0  ;;  %v468_v0 = vmul.f32 %v449_v37, %v403_v17 }
 0x11f   :  { %406 = vst [vmem:[%s1186_s4 + $0x8] sm:$0xff] %v401_v25  ;;  %v447_v29 = vmul.f32 %v429_v26, %v401_v25  ;;  %v390_v30 = vadd.f32 %v374_v28, %v251_v58  ;;  %v724_v31 = vpop.f32.mrb[15].mxu0 }
 0x120   :  { %409 = vst [vmem:[%s1186_s4 + $0x20] sm:$0xff] %v404_v27  ;;  %v450_v41 = vmul.f32 %v444_v40, %v404_v27 }
 0x121   :  { %v452_v34 = vadd.f32 %v447_v29, %v446_v24  ;;  %v466_v35 = vmul.f32 %v447_v29, %v401_v25  ;;  %v402_v36 = vadd.f32 %v526_v7, %v390_v30 }
 0x122   :  { %v469_v46 = vmul.f32 %v450_v41, %v404_v27 }
 0x123   :  { %v470_v38 = vadd.f32 %v466_v35, %v465_v33  ;;  %407 = vst [vmem:[%s1186_s4 + $0x10] sm:$0xff] %v402_v36  ;;  %v448_v39 = vmul.f32 %v434_v16, %v402_v36 }
 0x125   :  { %v453_v42 = vadd.f32 %v452_v34, %v448_v39  ;;  %v467_v43 = vmul.f32 %v448_v39, %v402_v36 }
 0x127   :  { %v454_v44 = vadd.f32 %v453_v42, %v449_v37  ;;  %v471_v45 = vadd.f32 %v470_v38, %v467_v43 }
 0x129   :  { %v455_v47 = vadd.f32 %v454_v44, %v450_v41  ;;  %v472_v48 = vadd.f32 %v471_v45, %v468_v0 }
 0x12b   :  { %v456_v49 = vrot.slane %v455_v47, 4  ;;  %v473_v50 = vadd.f32 %v472_v48, %v469_v46 }
 0x12d   :  { %v457_v51 = vadd.f32 %v456_v49, %v455_v47  ;;  %v474_v52 = vrot.slane %v473_v50, 4 }
 0x12f   :  { %v458_v53 = vrot.slane %v457_v51, 2  ;;  %v475_v54 = vadd.f32 %v474_v52, %v473_v50 }
 0x131   :  { %v459_v55 = vadd.f32 %v458_v53, %v457_v51  ;;  %v476_v56 = vrot.slane %v475_v54, 2 }
 0x133   :  { %v460_v57 = vrot.slane %v459_v55, 1  ;;  %v477_v58 = vadd.f32 %v476_v56, %v475_v54 }
 0x135   :  { %v461_v60 = vadd.f32 %v460_v57, %v459_v55  ;;  %v478_v61 = vrot.slane %v477_v58, 1 }
 0x137   :  { %v462_v63 = vadd.f32 %v461_v60, %v451_v59  ;;  %v479_v8 = vadd.f32 %v478_v61, %v477_v58 }
 0x139   :  { %463 = vst [vmem:[%s1183_s5] sm:$0x1] %v462_v63  ;;  %v480_v1 = vadd.f32 %v479_v8, %v464_v62 }
 0x13b   :  { %481 = vst [vmem:[%s1184_s6] sm:$0x1] %v480_v1 }

</bundles_post_ra>
